<compile_context>
chip_gen: v6e
topology: v6e:2x2x1
jax: 0.10.0
libtpu: 0.0.40
codegen_flags: <defaults>
</compile_context>

<pallas_src>
import functools

import jax
import jax.numpy as jnp
import numpy as np
from jax.experimental import pallas as pl
from jax.experimental.pallas import tpu as pltpu

OUT_PAD = 128          # logits (2) padded to a full lane width -> unmasked stores
H1 = 256               # first MLP hidden width  (Linear(D, 256))
H2 = 64                # second MLP hidden width (Linear(256, 64))
H2_PAD = 128           # lane-dense padded width for the second hidden layer


# ---------------------------------------------------------------------------
# Host-side spectral constants (scipy.fftpack conventions, norm=None)
# ---------------------------------------------------------------------------
def _dct2_matrix(n: int) -> np.ndarray:
    # DCT-II: y[k] = 2 * sum_m x[m] * cos(pi*(2m+1)*k / (2n))
    k = np.arange(n)[:, None].astype(np.float64)
    m = np.arange(n)[None, :].astype(np.float64)
    return 2.0 * np.cos(np.pi * (2.0 * m + 1.0) * k / (2.0 * n))


def _idct2_matrix(n: int) -> np.ndarray:
    # scipy idct(type=2) == unnormalized DCT-III
    m = np.arange(n)[:, None].astype(np.float64)
    k = np.arange(n)[None, :].astype(np.float64)
    mat = 2.0 * np.cos(np.pi * k * (2.0 * m + 1.0) / (2.0 * n))
    mat[:, 0] = 1.0
    return mat


@functools.lru_cache(maxsize=None)
def _fused_token_weights(seq_len: int, i: int, j: int) -> np.ndarray:
    """Per-token weights w (length seq_len) such that, for masked hidden states e,
       sum_s w[s] * e[b, s, :] == mean_seq( idct(band * dct(e[b, 1:, :])) / 254 ).
    Token 0 gets weight 0 (the module drops it before the DCT)."""
    n = seq_len - 1
    C = _dct2_matrix(n)
    Ci = _idct2_matrix(n)
    k = np.arange(n)
    band = ((k >= i) & (k < j)).astype(np.float64)[:, None]        # (N, 1)
    M = (Ci @ (band * C)) / 254.0                                  # (N, N)
    # TODO(synk): /254 is the module's hard-coded constant (exact 1/(2N) only at
    # N == 127); kept verbatim for fidelity.
    full = np.zeros((seq_len,), np.float32)
    full[1:] = M.mean(axis=0).astype(np.float32)
    return full


# ---------------------------------------------------------------------------
# Pallas kernel: grid = (batch tiles [parallel], seq tiles [arbitrary])
# ---------------------------------------------------------------------------
def _spectral_kernel(emb_ref, w_ref, w1_ref, b1_ref, w2_ref, b2_ref, w3_ref, b3_ref,
                     out_ref, acc_ref):
    s = pl.program_id(1)

    @pl.when(s == 0)
    def _init():
        acc_ref[...] = jnp.zeros_like(acc_ref)

    # Fused (mask * spectral) weights applied as a lane-broadcast multiply (VPU) plus
    # a reduction over the sequence tile (XLU).  bf16 embeddings promote against the
    # f32 weights, so the accumulation over the sequence is exact f32.
    acc_ref[...] += jnp.sum(emb_ref[...] * w_ref[...], axis=1)          # (Bt, D) f32

    @pl.when(s == pl.num_programs(1) - 1)
    def _finalize():
        v = acc_ref[...]                                                # (Bt, D) f32
        h = jnp.maximum(
            jnp.dot(v, w1_ref[...], preferred_element_type=jnp.float32) + b1_ref[...],
            0.0)
        h = jnp.maximum(
            jnp.dot(h, w2_ref[...], preferred_element_type=jnp.float32) + b2_ref[...],
            0.0)
        out = jnp.dot(h, w3_ref[...], preferred_element_type=jnp.float32) + b3_ref[...]
        out_ref[...] = out.astype(out_ref.dtype)                        # (Bt, OUT_PAD)


# ---------------------------------------------------------------------------
# VMEM-budget-driven tile selection
# ---------------------------------------------------------------------------
def _vmem_limit_bytes() -> int:
    cap = 64 * 1024 * 1024              # conservative default: v7x per-TC VMEM
    try:
        info = pltpu.get_tpu_info()
        cap = int(getattr(info, "vmem_capacity_bytes", cap) or cap)
    except Exception:
        pass
    return int(cap * 0.85)              # headroom for compiler-internal scratch


def _select_tiles(B, S, D, emb_itemsize, budget_bytes):
    """Largest (Bt, Ts) whose per-grid-step working set fits the VMEM budget."""
    # Per (batch-row x token) bytes inside one grid step:
    #   double-buffered embedding block             2 * D * emb_itemsize
    #   double-buffered (Ts, 1) weight block        2 * 128 * 4  (lane-padded)
    #   f32 intermediates of the multiply/reduce    ~3 * D * 4   (conservative)
    per_elem = 2 * D * emb_itemsize + 2 * 128 * 4 + 3 * D * 4
    per_row = 2 * OUT_PAD * 4 + max(D, 128) * 4     # output block + f32 accumulator
    # >= 2 batch grid steps so the "parallel" axis can shard across both v7x cores.
    bt_cap = min(256, max(1, (B + 1) // 2)) if B > 1 else 1

    ts_cands = [S] + sorted({t for t in range(8, S, 8) if S % t == 0}, reverse=True)
    for ts in ts_cands:
        bt = min(bt_cap, budget_bytes // (ts * per_elem + per_row))
        if bt >= 1:
            return int(bt), int(ts)
    # TODO(synk): nothing fits (huge S with no multiple-of-8 divisor); fall back to
    # the smallest legal tile and rely on the explicit vmem_limit headroom.
    return 1, int(ts_cands[-1])


# ---------------------------------------------------------------------------
# Wrapper matching SpectralClassifier.forward
# ---------------------------------------------------------------------------
def spectral_classifier(last_hidden_state, attention_mask, params, i, j,
                        return_prob=False, tile_override=None):
    w1, b1, w2, b2, w3, b3 = params
    B, S, D = last_hidden_state.shape
    emb_itemsize = jnp.dtype(last_hidden_state.dtype).itemsize

    # Fused per-token spectral weights (cached) x attention mask -> one tiny f32
    # weight stream; token 0's weight is 0 so the embeddings need no slicing/copy.
    r_full = jnp.asarray(_fused_token_weights(int(S), int(i), int(j)))        # (S,)
    w = (attention_mask.astype(jnp.float32) * r_full[None, :])[..., None]     # (B,S,1)

    # Lane-dense MLP: zero-pad hidden-2 and the logits to 128 output lanes.
    w2p = jnp.pad(w2, ((0, 0), (0, H2_PAD - w2.shape[1])))            # (256, 128)
    b2p = jnp.pad(b2, ((0, 0), (0, H2_PAD - b2.shape[1])))            # (1, 128)
    w3p = jnp.pad(w3, ((0, H2_PAD - w3.shape[0]), (0, OUT_PAD - w3.shape[1])))
    b3p = jnp.pad(b3, ((0, 0), (0, OUT_PAD - b3.shape[1])))           # (1, 128)

    vmem_limit = _vmem_limit_bytes()
    weight_bytes = 2 * 4 * (D * H1 + H1 + H1 * H2_PAD + H2_PAD
                            + H2_PAD * OUT_PAD + OUT_PAD)
    budget = max(vmem_limit * 7 // 10 - weight_bytes, 1 << 20)
    if tile_override is not None:
        Bt, Ts = tile_override
    else:
        Bt, Ts = _select_tiles(B, S, D, emb_itemsize, budget)
    assert S % Ts == 0 and (Ts % 8 == 0 or Ts == S), (Bt, Ts, S)
    nb = pl.cdiv(B, Bt)           # partial last batch block is fine: sliced away below
    ns = S // Ts

    cost = pl.CostEstimate(
        flops=int(3 * B * S * D
                  + 2 * B * (D * H1 + H1 * H2_PAD + H2_PAD * OUT_PAD)),
        transcendentals=0,
        bytes_accessed=int(B * S * D * emb_itemsize + B * S * 4
                           + weight_bytes // 2 + nb * Bt * OUT_PAD * 4))

    out = pl.pallas_call(
        _spectral_kernel,
        out_shape=jax.ShapeDtypeStruct((nb, Bt, OUT_PAD), jnp.float32),
        grid_spec=pltpu.PrefetchScalarGridSpec(
            num_scalar_prefetch=0,
            grid=(nb, ns),
            in_specs=[
                pl.BlockSpec((Bt, Ts, D), lambda b, s: (b, s, 0)),      # hidden states
                pl.BlockSpec((Bt, Ts, 1), lambda b, s: (b, s, 0)),      # fused weights
                pl.BlockSpec((D, H1), lambda b, s: (0, 0)),             # W1
                pl.BlockSpec((1, H1), lambda b, s: (0, 0)),             # b1
                pl.BlockSpec((H1, H2_PAD), lambda b, s: (0, 0)),        # W2 (padded)
                pl.BlockSpec((1, H2_PAD), lambda b, s: (0, 0)),         # b2 (padded)
                pl.BlockSpec((H2_PAD, OUT_PAD), lambda b, s: (0, 0)),   # W3 (padded)
                pl.BlockSpec((1, OUT_PAD), lambda b, s: (0, 0)),        # b3 (padded)
            ],
            out_specs=pl.BlockSpec((None, Bt, OUT_PAD), lambda b, s: (b, 0, 0)),
            scratch_shapes=[pltpu.VMEM((Bt, D), jnp.float32)],
        ),
        compiler_params=pltpu.CompilerParams(
            dimension_semantics=("parallel", "arbitrary"),
            vmem_limit_bytes=int(vmem_limit)),
        cost_estimate=cost,
    )(last_hidden_state, w, w1, b1, w2p, b2p, w3p, b3p)

    logits = out.reshape(nb * Bt, OUT_PAD)[:B, :2]
    if return_prob:
        return jax.nn.softmax(logits, axis=1)        # matches F.softmax(dim=1)
    return logits


# ---------------------------------------------------------------------------
# Pure-JAX reference (un-fused, mirrors the PyTorch module)
# ---------------------------------------------------------------------------
def _reference(last_hidden_state, attention_mask, params, i, j):
    w1, b1, w2, b2, w3, b3 = params
    x = last_hidden_state.astype(jnp.float32)
    e = x * attention_mask[:, :, None].astype(jnp.float32)
    e = e[:, 1:, :]
    N = e.shape[1]
    C = jnp.asarray(_dct2_matrix(N).astype(np.float32))
    Ci = jnp.asarray(_idct2_matrix(N).astype(np.float32))
    dcts = jnp.einsum('kn,bnd->bkd', C, e)
    k = jnp.arange(N)
    band = ((k >= i) & (k < j)).astype(jnp.float32)
    dcts = dcts * band[None, :, None]
    idcts = jnp.einsum('nk,bkd->bnd', Ci, dcts) / 254.0
    v = jnp.mean(idcts, axis=1)
    h = jnp.maximum(v @ w1 + b1, 0.0)
    h = jnp.maximum(h @ w2 + b2, 0.0)
    return h @ w3 + b3


# ---------------------------------------------------------------------------
def _filter_band(max_seq_len, filt):
    x = max_seq_len - 1
    low = int(x / 16)
    mid = int(x / 4)
    if filt == 'low':
        return 0, low
    if filt == 'mid':
        return low, mid
    return mid, x


def _make_params(key, D):
    k1, k2, k3, kb1, kb2, kb3 = jax.random.split(key, 6)
    # Stored as (in, out) so the kernel computes x @ W + b (transpose of nn.Linear).
    w1 = jax.random.normal(k1, (D, H1), jnp.float32) * 0.05
    b1 = jax.random.normal(kb1, (1, H1), jnp.float32) * 0.01
    w2 = jax.random.normal(k2, (H1, H2), jnp.float32) * 0.05
    b2 = jax.random.normal(kb2, (1, H2), jnp.float32) * 0.01
    w3 = jax.random.normal(k3, (H2, 2), jnp.float32) * 0.05
    b3 = jax.random.normal(kb3, (1, 2), jnp.float32) * 0.01
    return (w1, b1, w2, b2, w3, b3)


if __name__ == "__main__":
    key = jax.random.PRNGKey(0)
    kp, ke1, ke2, _ = jax.random.split(key, 4)

    # --- Test 1: f32 embeddings, B=2, S=16, D=32, default tiling (2 batch steps) ---
    B, S, D = 2, 16, 32
    fi, fj = _filter_band(S, "mid")
    params = _make_params(kp, D)
    lhs = jax.random.normal(ke1, (B, S, D), jnp.float32)
    lens = np.array([12, 10])
    mask = jnp.asarray(np.arange(S)[None, :] < lens[:, None])          # (B, S) bool

    out = jax.block_until_ready(spectral_classifier(lhs, mask, params, fi, fj))
    ref = _reference(lhs, mask, params, fi, fj)
    np.testing.assert_allclose(np.asarray(out), np.asarray(ref), rtol=1e-4, atol=2e-5)

    # Softmax branch (plain-JAX glue around the same kernel).
    probs = jax.block_until_ready(
        spectral_classifier(lhs, mask, params, fi, fj, return_prob=True))
    np.testing.assert_allclose(np.asarray(probs.sum(axis=1)), np.ones(B), rtol=1e-5)

    # --- Test 2: bf16 embeddings pass straight through (no host cast/copy) ---
    lhs_bf16 = lhs.astype(jnp.bfloat16)
    out_bf16 = jax.block_until_ready(
        spectral_classifier(lhs_bf16, mask, params, fi, fj))
    ref_bf16 = _reference(lhs_bf16.astype(jnp.float32), mask, params, fi, fj)
    np.testing.assert_allclose(np.asarray(out_bf16), np.asarray(ref_bf16),
                               rtol=1e-4, atol=2e-5)

    # --- Test 3: multi-step grid: seq-axis accumulation + partial last batch block ---
    B3, S3, D3 = 5, 256, 32
    fi3, fj3 = _filter_band(S3, "mid")
    params3 = _make_params(kp, D3)
    lhs3 = jax.random.normal(ke2, (B3, S3, D3), jnp.float32)
    lens3 = np.array([200, 37, 256, 5, 129])
    mask3 = jnp.asarray(np.arange(S3)[None, :] < lens3[:, None])
    out3 = jax.block_until_ready(
        spectral_classifier(lhs3, mask3, params3, fi3, fj3, tile_override=(2, 128)))
    ref3 = _reference(lhs3, mask3, params3, fi3, fj3)
    np.testing.assert_allclose(np.asarray(out3), np.asarray(ref3),
                               rtol=5e-4, atol=5e-5)

    print("KERNEL_OK")
</pallas_src>

<mosaic_0001>
module attributes {stable_mosaic.version = 11 : i64} {
  func.func @_spectral_kernel(%arg0: i32, %arg1: i32, %arg2: memref<1x16x32xf32, #tpu.memory_space<vmem>>, %arg3: memref<1x16x1xf32, #tpu.memory_space<vmem>>, %arg4: memref<32x256xf32, #tpu.memory_space<vmem>>, %arg5: memref<1x256xf32, #tpu.memory_space<vmem>>, %arg6: memref<256x128xf32, #tpu.memory_space<vmem>>, %arg7: memref<1x128xf32, #tpu.memory_space<vmem>>, %arg8: memref<128x128xf32, #tpu.memory_space<vmem>>, %arg9: memref<1x128xf32, #tpu.memory_space<vmem>>, %arg10: memref<1x1x128xf32, #tpu.memory_space<vmem>>, %arg11: memref<1x32xf32, #tpu.memory_space<vmem>>) attributes {dimension_semantics = [#tpu.dimension_semantics<parallel>, #tpu.dimension_semantics<arbitrary>], iteration_bounds = array<i64: 2, 1>, scalar_prefetch = 0 : i64, scratch_operands = 1 : i64, tpu.core_type = #tpu.core_type<tc>, window_params = [{transform_indices = @transform_0, window_bounds = array<i64: 1, 16, 32>}, {transform_indices = @transform_1, window_bounds = array<i64: 1, 16, 1>}, {pipeline_mode = #tpu.pipeline_mode<synchronous>, transform_indices = @transform_2, window_bounds = array<i64: 32, 256>}, {pipeline_mode = #tpu.pipeline_mode<synchronous>, transform_indices = @transform_3, window_bounds = array<i64: 1, 256>}, {pipeline_mode = #tpu.pipeline_mode<synchronous>, transform_indices = @transform_4, window_bounds = array<i64: 256, 128>}, {pipeline_mode = #tpu.pipeline_mode<synchronous>, transform_indices = @transform_5, window_bounds = array<i64: 1, 128>}, {pipeline_mode = #tpu.pipeline_mode<synchronous>, transform_indices = @transform_6, window_bounds = array<i64: 128, 128>}, {pipeline_mode = #tpu.pipeline_mode<synchronous>, transform_indices = @transform_7, window_bounds = array<i64: 1, 128>}, {transform_indices = @transform_8, window_bounds = array<i64: 1, 1, 128>}]} {
    %c0_i32 = arith.constant 0 : i32
    %0 = arith.cmpi eq, %arg1, %c0_i32 : i32
    %1 = arith.extui %0 : i1 to i32
    %c0_i32_0 = arith.constant 0 : i32
    %2 = arith.cmpi ne, %1, %c0_i32_0 : i32
    scf.if %2 {
      %cst_12 = arith.constant 0.000000e+00 : f32
      %14 = vector.broadcast %cst_12 : f32 to vector<1x32xf32>
      %c0_13 = arith.constant 0 : index
      %c0_14 = arith.constant 0 : index
      %15 = vector.load %arg11[%c0_13, %c0_14] : memref<1x32xf32, #tpu.memory_space<vmem>>, vector<1x32xf32>
      tpu.vector_store %arg11[%c0_13, %c0_14], %14 {strides = array<i32>} : memref<1x32xf32, #tpu.memory_space<vmem>>, vector<1x32xf32>,
    } else {
    }
    %c0 = arith.constant 0 : index
    %c0_1 = arith.constant 0 : index
    %3 = vector.load %arg11[%c0, %c0_1] : memref<1x32xf32, #tpu.memory_space<vmem>>, vector<1x32xf32>
    %c0_2 = arith.constant 0 : index
    %c0_3 = arith.constant 0 : index
    %c0_4 = arith.constant 0 : index
    %4 = vector.load %arg2[%c0_2, %c0_3, %c0_4] : memref<1x16x32xf32, #tpu.memory_space<vmem>>, vector<1x16x32xf32>
    %c0_5 = arith.constant 0 : index
    %c0_6 = arith.constant 0 : index
    %c0_7 = arith.constant 0 : index
    %5 = vector.load %arg3[%c0_5, %c0_6, %c0_7] : memref<1x16x1xf32, #tpu.memory_space<vmem>>, vector<1x16x1xf32>
    %6 = vector.broadcast %5 : vector<1x16x1xf32> to vector<1x16x32xf32>
    %7 = arith.mulf %4, %6 : vector<1x16x32xf32>
    %cst = arith.constant dense<0.000000e+00> : vector<1x32xf32>
    %8 = vector.multi_reduction <add>, %7, %cst [1] : vector<1x16x32xf32> to vector<1x32xf32>
    %9 = arith.addf %3, %8 : vector<1x32xf32>
    %c0_8 = arith.constant 0 : index
    %c0_9 = arith.constant 0 : index
    %10 = vector.load %arg11[%c0_8, %c0_9] : memref<1x32xf32, #tpu.memory_space<vmem>>, vector<1x32xf32>
    tpu.vector_store %arg11[%c0_8, %c0_9], %9 {strides = array<i32>} : memref<1x32xf32, #tpu.memory_space<vmem>>, vector<1x32xf32>,
    %c0_i32_10 = arith.constant 0 : i32
    %11 = arith.cmpi eq, %arg1, %c0_i32_10 : i32
    %12 = arith.extui %11 : i1 to i32
    %c0_i32_11 = arith.constant 0 : i32
    %13 = arith.cmpi ne, %12, %c0_i32_11 : i32
    scf.if %13 {
      %c0_12 = arith.constant 0 : index
      %c0_13 = arith.constant 0 : index
      %14 = vector.load %arg11[%c0_12, %c0_13] : memref<1x32xf32, #tpu.memory_space<vmem>>, vector<1x32xf32>
      %c0_14 = arith.constant 0 : index
      %c0_15 = arith.constant 0 : index
      %15 = vector.load %arg4[%c0_14, %c0_15] : memref<32x256xf32, #tpu.memory_space<vmem>>, vector<32x256xf32>
      %cst_16 = arith.constant dense<0.000000e+00> : vector<1x256xf32>
      %16 = tpu.matmul %14, %15, %cst_16 {dimension_numbers = #tpu.dot_dimension_numbers<[1], [0], [0], [1], [0, 0, 1, 1], [], []>} : vector<1x32xf32>, vector<32x256xf32>, vector<1x256xf32> -> vector<1x256xf32>
      %c0_17 = arith.constant 0 : index
      %c0_18 = arith.constant 0 : index
      %17 = vector.load %arg5[%c0_17, %c0_18] : memref<1x256xf32, #tpu.memory_space<vmem>>, vector<1x256xf32>
      %18 = arith.addf %16, %17 : vector<1x256xf32>
      %cst_19 = arith.constant 0.000000e+00 : f32
      %19 = vector.broadcast %cst_19 : f32 to vector<1x256xf32>
      %20 = arith.maximumf %18, %19 : vector<1x256xf32>
      %c0_20 = arith.constant 0 : index
      %c0_21 = arith.constant 0 : index
      %21 = vector.load %arg6[%c0_20, %c0_21] : memref<256x128xf32, #tpu.memory_space<vmem>>, vector<256x128xf32>
      %cst_22 = arith.constant dense<0.000000e+00> : vector<1x128xf32>
      %22 = tpu.matmul %20, %21, %cst_22 {dimension_numbers = #tpu.dot_dimension_numbers<[1], [0], [0], [1], [0, 0, 1, 1], [], []>} : vector<1x256xf32>, vector<256x128xf32>, vector<1x128xf32> -> vector<1x128xf32>
      %c0_23 = arith.constant 0 : index
      %c0_24 = arith.constant 0 : index
      %23 = vector.load %arg7[%c0_23, %c0_24] : memref<1x128xf32, #tpu.memory_space<vmem>>, vector<1x128xf32>
      %24 = arith.addf %22, %23 : vector<1x128xf32>
      %cst_25 = arith.constant 0.000000e+00 : f32
      %25 = vector.broadcast %cst_25 : f32 to vector<1x128xf32>
      %26 = arith.maximumf %24, %25 : vector<1x128xf32>
      %c0_26 = arith.constant 0 : index
      %c0_27 = arith.constant 0 : index
      %27 = vector.load %arg8[%c0_26, %c0_27] : memref<128x128xf32, #tpu.memory_space<vmem>>, vector<128x128xf32>
      %cst_28 = arith.constant dense<0.000000e+00> : vector<1x128xf32>
      %28 = tpu.matmul %26, %27, %cst_28 {dimension_numbers = #tpu.dot_dimension_numbers<[1], [0], [0], [1], [0, 0, 1, 1], [], []>} : vector<1x128xf32>, vector<128x128xf32>, vector<1x128xf32> -> vector<1x128xf32>
      %c0_29 = arith.constant 0 : index
      %c0_30 = arith.constant 0 : index
      %29 = vector.load %arg9[%c0_29, %c0_30] : memref<1x128xf32, #tpu.memory_space<vmem>>, vector<1x128xf32>
      %30 = arith.addf %28, %29 : vector<1x128xf32>
      %c0_31 = arith.constant 0 : index
      %c0_32 = arith.constant 0 : index
      %c0_33 = arith.constant 0 : index
      %31 = vector.load %arg10[%c0_31, %c0_32, %c0_33] : memref<1x1x128xf32, #tpu.memory_space<vmem>>, vector<1x1x128xf32>
      %32 = vector.shape_cast %31 : vector<1x1x128xf32> to vector<1x128xf32>
      %33 = vector.shape_cast %30 : vector<1x128xf32> to vector<1x1x128xf32>
      tpu.vector_store %arg10[%c0_31, %c0_32, %c0_33], %33 {strides = array<i32>} : memref<1x1x128xf32, #tpu.memory_space<vmem>>, vector<1x1x128xf32>,
    } else {
    }
    return
  }
  func.func @transform_0(%arg0: i32, %arg1: i32) -> (i32, i32, i32) {
    %c0_i32 = arith.constant 0 : i32
    %c0_i32_0 = arith.constant 0 : i32
    return %arg0, %arg1, %c0_i32 : i32, i32, i32
  }
  func.func @transform_1(%arg0: i32, %arg1: i32) -> (i32, i32, i32) {
    %c0_i32 = arith.constant 0 : i32
    %c0_i32_0 = arith.constant 0 : i32
    return %arg0, %arg1, %c0_i32 : i32, i32, i32
  }
  func.func @transform_2(%arg0: i32, %arg1: i32) -> (i32, i32) {
    %c0_i32 = arith.constant 0 : i32
    %c0_i32_0 = arith.constant 0 : i32
    %c0_i32_1 = arith.constant 0 : i32
    return %c0_i32, %c0_i32_0 : i32, i32
  }
  func.func @transform_3(%arg0: i32, %arg1: i32) -> (i32, i32) {
    %c0_i32 = arith.constant 0 : i32
    %c0_i32_0 = arith.constant 0 : i32
    %c0_i32_1 = arith.constant 0 : i32
    return %c0_i32, %c0_i32_0 : i32, i32
  }
  func.func @transform_4(%arg0: i32, %arg1: i32) -> (i32, i32) {
    %c0_i32 = arith.constant 0 : i32
    %c0_i32_0 = arith.constant 0 : i32
    %c0_i32_1 = arith.constant 0 : i32
    return %c0_i32, %c0_i32_0 : i32, i32
  }
  func.func @transform_5(%arg0: i32, %arg1: i32) -> (i32, i32) {
    %c0_i32 = arith.constant 0 : i32
    %c0_i32_0 = arith.constant 0 : i32
    %c0_i32_1 = arith.constant 0 : i32
    return %c0_i32, %c0_i32_0 : i32, i32
  }
  func.func @transform_6(%arg0: i32, %arg1: i32) -> (i32, i32) {
    %c0_i32 = arith.constant 0 : i32
    %c0_i32_0 = arith.constant 0 : i32
    %c0_i32_1 = arith.constant 0 : i32
    return %c0_i32, %c0_i32_0 : i32, i32
  }
  func.func @transform_7(%arg0: i32, %arg1: i32) -> (i32, i32) {
    %c0_i32 = arith.constant 0 : i32
    %c0_i32_0 = arith.constant 0 : i32
    %c0_i32_1 = arith.constant 0 : i32
    return %c0_i32, %c0_i32_0 : i32, i32
  }
  func.func @transform_8(%arg0: i32, %arg1: i32) -> (i32, i32, i32) {
    %c0_i32 = arith.constant 0 : i32
    %c0_i32_0 = arith.constant 0 : i32
    %c0_i32_1 = arith.constant 0 : i32
    return %arg0, %c0_i32, %c0_i32_0 : i32, i32, i32
  }
}

</mosaic_0001>

<bundles_post_ra>
// kernel: tpu_custom_call.1
= control target key start
LH: loop header
LB: loop body
LE: loop exit
PB: predicated region body
PF: predicated region fallthrough
CT: control target
= control target key end

     0   :  { %13 = vsyncpa [#allocation4], 0  ;;  %s1498_s0 = inlined_call_operand.vmem [shape: f32[2,16,32], index: 0, kind: input, shape index: {}]   ;;  %s1499_s1 = inlined_call_operand.vmem [shape: f32[2,16,1], index: 1, kind: input, shape index: {}]   ;;  %s1500_s2 = inlined_call_operand.hbm [shape: f32[32,256], index: 2, kind: input, shape index: {}]   ;;  %s1501_s3 = inlined_call_operand.vmem [shape: f32[1,256], index: 3, kind: input, shape index: {}]   ;;  %s1502_s4 = inlined_call_operand.hbm [shape: f32[256,128], index: 4, kind: input, shape index: {}]   ;;  %s1503_s5 = inlined_call_operand.vmem [shape: f32[1,128], index: 5, kind: input, shape index: {}]   ;;  %s1504_s6 = inlined_call_operand.hbm [shape: f32[128,128], index: 6, kind: input, shape index: {}]   ;;  %s1505_s7 = inlined_call_operand.vmem [shape: f32[1,128], index: 7, kind: input, shape index: {}]   ;;  %s1506_s8 = inlined_call_operand.hbm [shape: f32[2,1,128], index: 8, kind: output, shape index: {}]  }
   0x1   :  { %14 = vsyncpa [#allocation7], 0 }
   0x2   :  { %15 = vsyncpa [#allocation5], 0 }
   0x3   :  { %17 = vsyncpa [#allocation5 + $0x1], 0  ;;  %s1292_s27 = smov 0   ;;  %s1294_s28 = smov 0  }
   0x4   :  { %s1296_s29 = smov 0   ;;  %s1298_s30 = smov 0  }
   0x5   :  { %s1300_s9 = smov 0   ;;  %s1302_s10 = smov 0  }
   0x6 LB: > { %s870_s11 = sadd.s32 4294967295, %s1234_s10   ;;  %s871_s12 = sadd.s32 4294967294, %s1234_s10   ;;  %s1234_s10 = sphi %s1302_s10, %s23_s10   ;;  %s1230_s9 = sphi %s1300_s9, %s1521_s9   ;;  %s1226_s30 = sphi %s1298_s30, %s1520_s30   ;;  %s1222_s29 = sphi %s1296_s29, %s1519_s29   ;;  %s1218_s28 = sphi %s1294_s28, %s1518_s28   ;;  %s1214_s27 = sphi %s1292_s27, %s1517_s27  }
   0x7   : > { %s35_s13 = sadd.s32 1, %s1230_s9  ;;  %s224_s14 = sadd.s32 1, %s1222_s29 }
   0x8   : > { %p37_p0 = scmp.ge.s32.totalorder %s35_s13, 2  ;;  %p234_p1 = scmp.ne.s32.totalorder %s1222_s29, %s1218_s28 }
   0x9   : > { %p235_p2 = scmp.eq.s32.totalorder %s870_s11, 1  ;;  %p240_p3 = scmp.ne.s32.totalorder %s1218_s28, %s1214_s27 }
   0xa   : > { %s1523_s13 = smov (%p37_p0, %s35_s13), 0  ;;  %p241_p5 = scmp.eq.s32.totalorder %s871_s12, 1 }
   0xb   : > { %1509 = sst [smem:[#allocation13_spill]] %s1523_s13  ;;  %p1332_p4 = por %p235_p2, %p234_p1 }
   0xc   : > { %s221_s16 = ssub.s32 %s1230_s9, %s1523_s13  ;;  %p872_p6 = scmp.ge.s32.totalorder %s1234_s10, 1 }
   0xd   : > { %p222_p7 = scmp.eq.s32.totalorder %s221_s16, 0  ;;  %p1339_p8 = por %p241_p5, %p240_p3 }
   0xe   : > { %p248_p9 = scmp.lt.s32.totalorder %s1234_s10, 3  ;;  %p1351_p11 = scmp.eq.s32.totalorder %s870_s11, 0 }
   0xf   : > { %s1345_s18 = scalar_select %p222_p7, %s1222_s29, %s224_s14  }
  0x10   : > { %p1347_p10 = pnand %p872_p6, %p248_p9  ;;  %s1236_s21 = smov [#allocation6]  }
  0x11   : > { %s276_s22 = sshll.u32 %s1236_s21, 4  ;;  %s1237_s24 = smov [#allocation3]   ;;  %s277_s22 = int_to_ptr.vmem [resolvable:$true] %s276_s22 }
  0x12   : > { %p992_p12 = pneg %p1347_p10  ;;  %s260_s25 = sshll.u32 %s1237_s24, 4  ;;  %s261_s25 = int_to_ptr.vmem [resolvable:$true] %s260_s25 }
  0x13   : > { %s1083_s26 = scalar_lea.vmem %s277_s22, 4096  ;;  %p1091_p5 = scmp.lt.s32.totalorder %s277_s22, %s277_s22 }
  0x14   : > { %p1359_p13 = pnand %p1351_p11, %p992_p12  ;;  %p1084_p1 = scmp.ne.s32.totalorder %s277_s22, %s1083_s26 }
  0x15   : > { %p1092_p6 = scmp.lt.s32.totalorder %s1083_s26, %s1083_s26 }
  0x16   : > { %p1074_p0 = pneg %p1359_p13 }
  0x17   : > { %p1093_p7 = por %p1092_p6, %p1091_p5 }
  0x18   : > { %p1086_p2 = pnand %p1084_p1, %p1074_p0 }
  0x1a   : > { %p1087_p3 = pneg %p1086_p2 }
  0x1c   : > { %p1094_p9 = pnand %p1093_p7, %p1087_p3 }
  0x1e   : > { %1097 = shalt.err (!%p1094_p9)
}
  0x1f   : > { %s1508_s11 = smov 128   ;;  %s1239_s12 = smov 8  }
  0x20   : > { %998 = dma.hbm_to_vmem [thread:$0]  (!%p1359_p13), %s1502_s4, 4096, %s277_s22, [#allocation7], %s1508_s11, %s1508_s11, %s1239_s12  }
  0x21   : > { %s1109_s21 = scalar_lea.vmem %s261_s25, 1024  ;;  %p1117_p3 = scmp.lt.s32.totalorder %s261_s25, %s261_s25 }
  0x22   : > { %p1110_p12 = scmp.ne.s32.totalorder %s261_s25, %s1109_s21  ;;  %p1118_p5 = scmp.lt.s32.totalorder %s1109_s21, %s1109_s21 }
  0x24   : > { %p1112_p1 = pnand %p1110_p12, %p1074_p0  ;;  %p1119_p6 = por %p1118_p5, %p1117_p3 }
  0x26   : > { %p1113_p2 = pneg %p1112_p1 }
  0x28   : > { %p1120_p7 = pnand %p1119_p6, %p1113_p2 }
  0x2a   : > { %1123 = shalt.err (!%p1120_p7)
}
  0x2b   : > { %s1240_s24 = smov 256   ;;  %s1241_s26 = smov 16  }
  0x2c   : > { %995 = dma.hbm_to_vmem [thread:$0]  (!%p1359_p13), %s1500_s2, 1024, %s261_s25, [#allocation4], %s1240_s24, %s1240_s24, %s1241_s26  }
  0x2d   : > { %s1242_s22 = smov [#allocation8]  }
  0x2e   : > { %s292_s16 = sshll.u32 %s1242_s22, 4  ;;  %s293_s16 = int_to_ptr.vmem [resolvable:$true] %s292_s16 }
  0x2f   : > { %s1135_s11 = scalar_lea.vmem %s293_s16, 2048  ;;  %p1143_p2 = scmp.lt.s32.totalorder %s293_s16, %s293_s16 }
  0x30   : > { %p1136_p9 = scmp.ne.s32.totalorder %s293_s16, %s1135_s11  ;;  %p1144_p3 = scmp.lt.s32.totalorder %s1135_s11, %s1135_s11 }
  0x32   : > { %p1138_p12 = pnand %p1136_p9, %p1074_p0  ;;  %p1145_p5 = por %p1144_p3, %p1143_p2 }
  0x34   : > { %p1139_p1 = pneg %p1138_p12 }
  0x36   : > { %p1146_p6 = pnand %p1145_p5, %p1139_p1 }
  0x38   : > { %1149 = shalt.err (!%p1146_p6)
}
  0x39   : > { %s1515_s21 = smov 128   ;;  %337 = sbr.rel (%p1347_p10) target bundleno = 836 (0x344), region = 52 }
  0x3a   : > { %1001 = dma.hbm_to_vmem [thread:$0]  (!%p1359_p13), %s1504_s6, 2048, %s293_s16, [#allocation7], %s1515_s21, %s1515_s21, %s1239_s12  }
  0x3e   : > { %1201 = dma.done.wait (%p1351_p11), [#allocation4], 1024  }
  0x3f   : > { %1203 = vsyncadd (%p1351_p11), [#allocation4], 4294966272 }
  0x40   : > { %1205 = dma.done.wait (%p1351_p11), [#allocation7], 6144  }
  0x41   : > { %1207 = vsyncadd (%p1351_p11), [#allocation7], 4294961152  ;;  %p392_p0 = scmp.lt.s32.totalorder %s1226_s30, 1  ;;  %v1243_v0 = vmov 0   ;;  %vm415_vm0 = vcmask 253952   ;;  %v1244_v2 = vmov 0.0  }
  0x42   : > { %1071 = vset.pattern.permute.xlu0 %v1243_v0  ;;  %416 = vst.msk [vmem:[#allocation2] sm:$0x1] %vm415_vm0, %v1244_v2  ;;  %538 = vmatprep.mubr.f32.mxu0 %v1244_v2  ;;  %v458_v4 = vld [vmem:[#allocation3 + $0x38] sm:$0xff]  ;;  %v457_v5 = vld [vmem:[#allocation3 + $0x30] sm:$0xff]  ;;  %v456_v6 = vld [vmem:[#allocation3 + $0x28] sm:$0xff]  ;;  %vm434_vm1 = vcmask 261120  }
  0x43   : > { %s1407_s23 = scalar_select %p392_p0, %s1226_s30, 1  ;;  %498 = vmatprep.subr.mxu0 %v458_v4  ;;  %v455_v7 = vld [vmem:[#allocation3 + $0x20] sm:$0xff]  ;;  %v454_v8 = vld [vmem:[#allocation3 + $0x18] sm:$0xff]  ;;  %v453_v9 = vld [vmem:[#allocation3 + $0x10] sm:$0xff]  ;;  %vm1245_vm2 = vmmov 0  }
  0x44   : > { %499 = vmatpush1.msra.mxu0 %v457_v5  ;;  %v452_v10 = vld [vmem:[#allocation3 + $0x8] sm:$0xff]  ;;  %v451_v11 = vld [vmem:[#allocation3] sm:$0xff]  ;;  %v578_v12 = vld [vmem:[#allocation6 + $0xf8] sm:$0xff]  ;;  %s389_s25 = sand.u32 1, %s1218_s28   ;;  %s886_s11 = sshll.u32 %s1226_s30, 4 }
  0x45   : > { %s889_s19 = sshll.u32 %s1407_s23, 4  ;;  %500 = vmatprep.subr.mxu0 %v456_v6  ;;  %v562_v13 = vld [vmem:[#allocation6 + $0x78] sm:$0xff]  ;;  %v577_v14 = vld [vmem:[#allocation6 + $0xf0] sm:$0xff]  ;;  %891 = vmatprep.subr.mxu1 %v578_v12  ;;  %v576_v16 = vld [vmem:[#allocation6 + $0xe8] sm:$0xff]  ;;  %s390_s12 = scalar_lea.vmem [#allocation9], %s389_s25 }
  0x46   : > { %s409_s24 = scalar_lea.vmem %s1499_s1, %s889_s19  ;;  %501 = vmatpush1.msra.mxu0 %v455_v7  ;;  %v561_v15 = vld [vmem:[#allocation6 + $0x70] sm:$0xff]  ;;  %892 = vmatpush3.msra.mxu1 %v562_v13  ;;  %v560_v17 = vld [vmem:[#allocation6 + $0x68] sm:$0xff]  ;;  %v575_v18 = vld [vmem:[#allocation6 + $0xe0] sm:$0xff]  ;;  %s399_s14 = scalar_lea.vmem %s1498_s0, %s889_s19 }
  0x47   : > { %v420_v1 = vld [vmem:[%s409_s24] sm:$0xff]  ;;  %v421_v3 = vld [vmem:[%s409_s24 + $0x8] sm:$0xff]  ;;  %502 = vmatprep.subr.mxu0 %v454_v8  ;;  %893 = vmatprep.subr.mxu1 %v577_v14  ;;  %v573_v22 = vld [vmem:[#allocation6 + $0xd0] sm:$0xff]  ;;  %s752_s24 = sshll.u32 %s390_s12, 4  ;;  %s740_s22 = scalar_lea.sflag [#allocation5], %s389_s25  ;;  %s753_s24 = int_to_ptr.vmem [resolvable:$true] %s752_s24 }
  0x48   : > { %424 = vperm.xlu0 %1071, %v420_v1   ;;  %503 = vmatpush1.msra.mxu0 %v453_v9  ;;  %v559_v19 = vld [vmem:[#allocation6 + $0x60] sm:$0xff]  ;;  %v574_v20 = vld [vmem:[#allocation6 + $0xd8] sm:$0xff]  ;;  %v557_v23 = vld [vmem:[#allocation6 + $0x50] sm:$0xff]  ;;  %s1150_s16 = scalar_lea.vmem %s753_s24, 16  ;;  %s1246_s21 = smov [#allocation9]  }
  0x49   : > { %504 = vmatprep.subr.mxu0 %v452_v10  ;;  %894 = vmatpush3.msra.mxu1 %v561_v15  ;;  %v558_v21 = vld [vmem:[#allocation6 + $0x58] sm:$0xff]  ;;  %v572_v24 = vld [vmem:[#allocation6 + $0xc8] sm:$0xff]  ;;  %v571_v26 = vld [vmem:[#allocation6 + $0xc0] sm:$0xff]  ;;  %v461_v10 = vlaneseq  ;;  %p1151_p10 = scmp.ne.s32.totalorder %s753_s24, %s1150_s16  ;;  %s1154_s30 = sshll.u32 %s1246_s21, 4  ;;  %s1155_s30 = int_to_ptr.vmem [resolvable:$false] %s1154_s30 }
  0x4a   : > { %505 = vmatpush1.msra.mxu0 %v451_v11  ;;  %895 = vmatprep.subr.mxu1 %v576_v16  ;;  %v556_v25 = vld [vmem:[#allocation6 + $0x48] sm:$0xff]  ;;  %v555_v27 = vld [vmem:[#allocation6 + $0x40] sm:$0xff]  ;;  %v570_v28 = vld [vmem:[#allocation6 + $0xb8] sm:$0xff]  ;;  %s1156_s13 = scalar_lea.vmem %s1155_s30, 32  ;;  %p1157_p7 = scmp.lt.s32.totalorder %s753_s24, %s1155_s30 }
  0x4b   : > { %943 = vmatprep.subr.mxu0 %v1244_v2  ;;  %896 = vmatpush3.msra.mxu1 %v560_v17  ;;  %v554_v29 = vld [vmem:[#allocation6 + $0x38] sm:$0xff]  ;;  %v569_v30 = vld [vmem:[#allocation6 + $0xb0] sm:$0xff]  ;;  %v568_v32 = vld [vmem:[#allocation6 + $0xa8] sm:$0xff]  ;;  %v462_v11 = vshrl.u32 %v461_v10, 7  ;;  %p1152_p11 = pnand %p1151_p10, %p1332_p4  ;;  %p1158_p9 = scmp.lt.s32.totalorder %s1156_s13, %s1150_s16 }
  0x4c   : > { %429 = vperm.xlu0 %1071, %v421_v3   ;;  %897 = vmatprep.subr.mxu1 %v575_v18  ;;  %v553_v31 = vld [vmem:[#allocation6 + $0x30] sm:$0xff]  ;;  %v552_v33 = vld [vmem:[#allocation6 + $0x28] sm:$0xff]  ;;  %v567_v34 = vld [vmem:[#allocation6 + $0xa0] sm:$0xff] }
  0x4d   : > { %898 = vmatpush3.msra.mxu1 %v559_v19  ;;  %v551_v35 = vld [vmem:[#allocation6 + $0x20] sm:$0xff]  ;;  %v417_v50 = vld [vmem:[#allocation2] sm:$0x1]  ;;  %v565_v56 = vld [vmem:[#allocation6 + $0x90] sm:$0xff]  ;;  %v463_v12 = vsub.s32 0, %v462_v11  ;;  %v467_v14 = vsub.s32 1, %v462_v11  ;;  %p1153_p13 = pneg %p1152_p11  ;;  %p1159_p12 = por %p1158_p9, %p1157_p7 }
  0x4e   : > { %899 = vmatprep.subr.mxu1 %v574_v20  ;;  %v418_v37 = vld [vmem:[%s399_s14] sm:$0xff]  ;;  %v419_v38 = vld [vmem:[%s399_s14 + $0x8] sm:$0xff]  ;;  %v549_v57 = vld [vmem:[#allocation6 + $0x10] sm:$0xff]  ;;  %s1458_s14 = scalar_lea.hbm %s1506_s8, %s886_s11 }
  0x4f   : > { %900 = vmatpush3.msra.mxu1 %v558_v21  ;;  %v566_v54 = vld [vmem:[#allocation6 + $0x98] sm:$0xff]  ;;  %v564_v58 = vld [vmem:[#allocation6 + $0x88] sm:$0xff]  ;;  %v563_v60 = vld [vmem:[#allocation6 + $0x80] sm:$0xff]  ;;  %p1160_p1 = pnand %p1159_p12, %p1153_p13 }
  0x50   : > { %901 = vmatprep.subr.mxu1 %v573_v22  ;;  %v550_v55 = vld [vmem:[#allocation6 + $0x18] sm:$0xff]  ;;  %v548_v59 = vld [vmem:[#allocation6 + $0x8] sm:$0xff]  ;;  %v547_v61 = vld [vmem:[#allocation6] sm:$0xff] }
  0x51   : > { %902 = vmatpush3.msra.mxu1 %v557_v23  ;;  %v666_v62 = vld [vmem:[#allocation8 + $0x78] sm:$0xff]  ;;  %v665_v63 = vld [vmem:[#allocation8 + $0x70] sm:$0xff]  ;;  %v664_v0 = vld [vmem:[#allocation8 + $0x68] sm:$0xff] }
  0x52   : > { %903 = vmatprep.subr.mxu1 %v572_v24  ;;  %v663_v1 = vld [vmem:[#allocation8 + $0x60] sm:$0xff]  ;;  %v662_v3 = vld [vmem:[#allocation8 + $0x58] sm:$0xff]  ;;  %v661_v4 = vld [vmem:[#allocation8 + $0x50] sm:$0xff] }
  0x53   : > { %904 = vmatpush3.msra.mxu1 %v556_v25  ;;  %v660_v5 = vld [vmem:[#allocation8 + $0x48] sm:$0xff]  ;;  %v659_v6 = vld [vmem:[#allocation8 + $0x40] sm:$0xff]  ;;  %v658_v7 = vld [vmem:[#allocation8 + $0x38] sm:$0xff] }
  0x54   : > { %905 = vmatprep.subr.mxu1 %v571_v26  ;;  %v657_v8 = vld [vmem:[#allocation8 + $0x30] sm:$0xff]  ;;  %v656_v9 = vld [vmem:[#allocation8 + $0x28] sm:$0xff]  ;;  %v459_v13 = vld [vmem:[%s1501_s3] sm:$0x3] }
  0x55   : > { %906 = vmatpush3.msra.mxu1 %v555_v27  ;;  %v464_v15 = vrot.slane %v459_v13, %v463_v12  ;;  %v468_v16 = vrot.slane %v459_v13, %v467_v14  ;;  %v655_v23 = vld [vmem:[#allocation8 + $0x20] sm:$0xff]  ;;  %v654_v24 = vld [vmem:[#allocation8 + $0x18] sm:$0xff]  ;;  %v653_v25 = vld [vmem:[#allocation8 + $0x10] sm:$0xff] }
  0x56   : > { %907 = vmatprep.subr.mxu1 %v570_v28  ;;  %v652_v26 = vld [vmem:[#allocation8 + $0x8] sm:$0xff]  ;;  %v651_v27 = vld [vmem:[#allocation8] sm:$0xff] }
  0x57   : > { %908 = vmatpush3.msra.mxu1 %v554_v29  ;;  %v579_v29 = vld [vmem:[%s1503_s5] sm:$0x1] }
  0x58   : > { %909 = vmatprep.subr.mxu1 %v569_v30 }
  0x59   : > { %910 = vmatpush3.msra.mxu1 %v553_v31 }
  0x5a   : > { %911 = vmatprep.subr.mxu1 %v568_v32 }
  0x5b   : > { %912 = vmatpush3.msra.mxu1 %v552_v33 }
  0x5c   : > { %913 = vmatprep.subr.mxu1 %v567_v34  ;;  %v667_v34 = vld [vmem:[%s1505_s7] sm:$0x1] }
  0x5d   : > { %914 = vmatpush3.msra.mxu1 %v551_v35 }
  0x5e   : > { %915 = vmatprep.subr.mxu1 %v566_v54 }
  0x5f   : > { %916 = vmatpush3.msra.mxu1 %v550_v55 }
  0x60   : > { %917 = vmatprep.subr.mxu1 %v565_v56 }
  0x61   : > { %918 = vmatpush3.msra.mxu1 %v549_v57 }
  0x62   : > { %919 = vmatprep.subr.mxu1 %v564_v58 }
  0x63   : > { %920 = vmatpush3.msra.mxu1 %v548_v59 }
  0x64   : > { %921 = vmatprep.subr.mxu1 %v563_v60 }
  0x65   : > { %922 = vmatpush3.msra.mxu1 %v547_v61 }
  0xc3   : > { %v425_v36 = vpop.permute.xlu0 %424 }
  0xc4   : > { %v432_v39 = vmul.f32 %v425_v36, %v418_v37 }
  0xc6   : > { %v435_v42 = vsel %vm434_vm1, %v432_v39, 0.0 }
  0xc7   : > { %v430_v40 = vpop.permute.xlu0 %429 }
  0xc8   : > { %v433_v41 = vmul.f32 %v430_v40, %v419_v38 }
  0xca   : > { %v436_v43 = vsel %vm434_vm1, %v433_v41, 0.0 }
  0xcb   : > { %v437_v44 = vadd.f32 %v436_v43, %v435_v42 }
  0xcd   : > { %v438_v45 = vrot.slane %v437_v44, 4 }
  0xcf   : > { %v439_v46 = vadd.f32 %v438_v45, %v437_v44 }
  0xd1   : > { %v440_v47 = vrot.slane %v439_v46, 2 }
  0xd3   : > { %v441_v48 = vadd.f32 %v440_v47, %v439_v46 }
  0xd5   : > { %v442_v49 = vrot.slane %v441_v48, 1 }
  0xd7   : > { %v443_v51 = vadd.f32 %v442_v49, %v441_v48 }
  0xd9   : > { %v444_v52 = vadd.f32 %v443_v51, %v417_v50 }
  0xdb   : > { %446 = vst.msk [vmem:[#allocation2] sm:$0x1] %vm415_vm0, %v444_v52 }
  0xe2   : > { %v450_v53 = vld [vmem:[#allocation2] sm:$0x1] }
  0xe3   : > { %885 = vmatmul.mubr.msk.f32.vlgmr.msra.gmra.mxu0 %vm434_vm1, %v450_v53 }
  0xe4   : > { %944 = vmatpush3.msra.mxu0 %v666_v62  ;;  %975 = vmatprep.mubr.msk.f32.mxu0 %vm1245_vm2, %v1244_v2 }
  0xe5   : > { %945 = vmatprep.subr.mxu0 %v1244_v2 }
  0xe6   : > { %946 = vmatpush3.msra.mxu0 %v665_v63 }
  0xe7   : > { %947 = vmatprep.subr.mxu0 %v1244_v2 }
  0xe8   : > { %948 = vmatpush3.msra.mxu0 %v664_v0 }
  0xe9   : > { %949 = vmatprep.subr.mxu0 %v1244_v2 }
  0xea   : > { %950 = vmatpush3.msra.mxu0 %v663_v1 }
  0xeb   : > { %951 = vmatprep.subr.mxu0 %v1244_v2 }
  0xec   : > { %952 = vmatpush3.msra.mxu0 %v662_v3 }
  0xed   : > { %953 = vmatprep.subr.mxu0 %v1244_v2 }
  0xee   : > { %954 = vmatpush3.msra.mxu0 %v661_v4 }
  0xef   : > { %955 = vmatprep.subr.mxu0 %v1244_v2 }
  0xf0   : > { %956 = vmatpush3.msra.mxu0 %v660_v5 }
  0xf1   : > { %957 = vmatprep.subr.mxu0 %v1244_v2 }
  0xf2   : > { %958 = vmatpush3.msra.mxu0 %v659_v6 }
  0xf3   : > { %959 = vmatprep.subr.mxu0 %v1244_v2 }
  0xf4   : > { %960 = vmatpush3.msra.mxu0 %v658_v7 }
  0xf5   : > { %961 = vmatprep.subr.mxu0 %v1244_v2 }
  0xf6   : > { %962 = vmatpush3.msra.mxu0 %v657_v8 }
  0xf7   : > { %963 = vmatprep.subr.mxu0 %v1244_v2 }
  0xf8   : > { %964 = vmatpush3.msra.mxu0 %v656_v9 }
  0xf9   : > { %965 = vmatprep.subr.mxu0 %v1244_v2 }
  0xfa   : > { %966 = vmatpush3.msra.mxu0 %v655_v23 }
  0xfb   : > { %967 = vmatprep.subr.mxu0 %v1244_v2 }
  0xfc   : > { %968 = vmatpush3.msra.mxu0 %v654_v24 }
  0xfd   : > { %969 = vmatprep.subr.mxu0 %v1244_v2 }
  0xfe   : > { %970 = vmatpush3.msra.mxu0 %v653_v25 }
  0xff   : > { %971 = vmatprep.subr.mxu0 %v1244_v2 }
 0x100   : > { %972 = vmatpush3.msra.mxu0 %v652_v26 }
 0x101   : > { %973 = vmatprep.subr.mxu0 %v1244_v2 }
 0x102   : > { %974 = vmatpush3.msra.mxu0 %v651_v27 }
 0x1a3   : > { %v540_v17 = vpop.f32.mrf.mxu0 }
 0x1a4   : > { %v541_v18 = vadd.f32 %v540_v17, %v464_v15 }
 0x1a5   : > { %v542_v19 = vpop.f32.mrf.mxu0 }
 0x1a6   : > { %v543_v20 = vadd.f32 %v542_v19, %v468_v16  ;;  %v545_v22 = vmax.f32 %v541_v18, 0.0 }
 0x1a8   : > { %v546_v21 = vmax.f32 %v543_v20, 0.0 }
 0x1aa   : > { %644 = vmatprep.mubr.f32.mxu1 %v546_v21 }
 0x1ab   : > { %645 = vmatmul.mubr.f32.vlgmr.msra.gmra.mxu1 %v545_v22 }
 0x26b   : > { %v923_v28 = vpop.f32.mrf.mxu1 }
 0x26d   : > { %v924_v30 = vpop.f32.mrf.mxu1 }
 0x26e   : > { %v925_v31 = vadd.f32 %v924_v30, %v923_v28 }
 0x270   : > { %v647_v32 = vadd.f32 %v925_v31, %v579_v29 }
 0x272   : > { %v650_v33 = vmax.f32 %v647_v32, 0.0 }
 0x274   : > { %976 = vmatmul.mubr.f32.vlgmr.msra.gmra.mxu0 %v650_v33 }
 0x334   : > { %v734_v2 = vpop.f32.mrf.mxu0 }
 0x335   : > { %v735_v35 = vadd.f32 %v734_v2, %v667_v34 }
 0x336   : > { %v977_v36 = vpop.f32.mrf.mxu0 }
 0x337   : > { %738 = vst [vmem:[%s390_s12] sm:$0x1] %v735_v35 }
 0x338   : > { %1163 = shalt.err (!%p1160_p1)
}
 0x339   : > { %s1164_s23 = scalar_lea.hbm %s1458_s14, 16  ;;  %s1168_s11 = scalar_lea.hbm %s1506_s8, 32 }
 0x33a   : > { %p1165_p2 = scmp.ne.s32.totalorder %s1458_s14, %s1164_s23  ;;  %p1169_p6 = scmp.lt.s32.totalorder %s1458_s14, %s1506_s8 }
 0x33b   : > { %p1170_p0 = scmp.lt.s32.totalorder %s1168_s11, %s1164_s23 }
 0x33c   : > { %p1166_p3 = pnand %p1165_p2, %p1332_p4 }
 0x33d   : > { %p1171_p10 = por %p1170_p0, %p1169_p6 }
 0x33e   : > { %p1167_p5 = pneg %p1166_p3 }
 0x340   : > { %p1172_p11 = pnand %p1171_p10, %p1167_p5 }
 0x342   : > { %1175 = shalt.err (!%p1172_p11)
}
 0x343   : > { %990 = dma.vmem_to_hbm [thread:$0]  (%p1332_p4), %s753_s24, 16, %s1458_s14, %s740_s22  }
 0x344 PF: > { %p1012_p13 = scmp.ge.s32.totalorder %s1234_s10, 2  ;;  %s764_s26 = sand.u32 1, %s1214_s27  }
 0x345   : > { %s765_s16 = scalar_lea.sflag [#allocation5], %s764_s26 }
 0x346   : > { %p1003_p7 = pnand %p1012_p13, %p1339_p8 }
 0x348   : > { %p1004_p9 = pneg %p1003_p7 }
 0x34a   : > { %1209 = dma.done.wait (%p1004_p9), %s765_s16, 16  }
 0x34b   : > { %1211 = vsyncadd (%p1004_p9), %s765_s16, 4294967280  ;;  %s23_s10 = sadd.s32 1, %s1234_s10   ;;  %s1516_s15 = sld [smem:[#allocation13_spill]] }
 0x34c   : > { %p20_p12 = scmp.ge.s32.totalorder %s23_s10, 4   ;;  %s1517_s27 = smov %s1218_s28 }
 0x34d   : > { %s1518_s28 = smov %s1222_s29  ;;  %s1519_s29 = smov %s1345_s18 }
 0x34e   : > { %s1520_s30 = smov %s1230_s9  ;;  %22 = sbr.rel (!%p20_p12) target bundleno = 6 (0x6), region = 111 }
 0x351   : > { %s1521_s9 = smov %s1516_s15 }
 0x353   :  { %769 = vsyncpa [#allocation4], 1 }
 0x354   :  { %771 = vsyncpa [#allocation4 + $0x1], 1 }
 0x355   :  { %772 = vsyncpa [#allocation7], 1 }
 0x356   :  { %773 = vsyncpa [#allocation5], 1 }
 0x357   :  { %775 = vsyncpa [#allocation5 + $0x1], 1 }

</bundles_post_ra>
